<compile_context>
chip_gen: v5e
topology: v5e:2x2
jax: 0.10.0
libtpu: 0.0.40
codegen_flags: <defaults>
</compile_context>

<pallas_src>
import jax
import jax.numpy as jnp
import numpy as np
from jax.experimental import pallas as pl
from jax.experimental.pallas import tpu as pltpu


# ----------------------------- Pallas kernel --------------------------------

def _cdiv(a, b):
    return -(-a // b)


def _round_up(v, m):
    return ((v + m - 1) // m) * m


def _matmul_kernel(x_ref, w_ref, o_ref):
    # Activation arrives f32 and is cast to bf16 in-register (no separate XLA
    # cast pass over M x K); weight is already bf16 and resident in VMEM.
    # f32 accumulation on the MXU; store in the requested output dtype.
    o_ref[...] = jnp.dot(
        x_ref[...].astype(jnp.bfloat16), w_ref[...],
        preferred_element_type=jnp.float32).astype(o_ref.dtype)


def _choose_tm(M, K, N, out_itemsize, *, tm_max=1024,
               vmem_budget_bytes=10 * 1024 * 1024):
    """Largest 8-aligned row tile that (a) fits a conservative VMEM budget
    (double-buffered f32 x-tile + double-buffered out-tile + resident bf16
    weight), (b) keeps >= 2 grid steps for M > 256 so v7x can shard across
    both TensorCores, and (c) minimizes edge-block padding."""
    per_row = 2 * K * 4 + 2 * N * out_itemsize      # x (f32, 2 bufs) + out (2 bufs)
    resident = 2 * K * N * 2                        # bf16 weight, worst-case 2 bufs
    avail = vmem_budget_bytes - resident
    tm_cap = max(8, (avail // max(per_row, 1)) // 8 * 8) if avail > 0 else 8
    tm_hi = max(8, min(tm_max, tm_cap))
    steps = _cdiv(M, tm_hi)
    if M > 256:
        steps = max(steps, 2)                       # keep both v7x TCs busy
    tm = _round_up(_cdiv(M, steps), 8)
    return max(8, min(tm, tm_hi))


def pallas_matmul(x, w, *, out_dtype=jnp.float32, tm_max=1024,
                  vmem_budget_bytes=10 * 1024 * 1024):
    """x [M, K] (f32) @ w [K, N] -> [M, N] with f32 MXU accumulation.

    No wrapper-side cast/pad/slice passes: activation cast happens in-kernel,
    the ragged M edge is handled by grid masking, and the output block's last
    dim equals N so no padded writeback or slice-back copy is needed.
    """
    M, K = x.shape
    K2, N = w.shape
    assert K == K2, "inner dimension mismatch"
    if M == 0:                                      # all-leaf upsample case
        return jnp.zeros((0, N), out_dtype)

    # Weight cast is a tiny, parameter-sized op (<< M*K activation bytes) and
    # halves the resident VMEM footprint + one-time weight DMA.
    wb = w.astype(jnp.bfloat16)

    out_itemsize = jnp.dtype(out_dtype).itemsize
    tm = _choose_tm(M, K, N, out_itemsize, tm_max=tm_max,
                    vmem_budget_bytes=vmem_budget_bytes)
    grid_m = _cdiv(M, tm)

    cost = pl.CostEstimate(
        flops=2 * M * K * N,
        transcendentals=0,
        bytes_accessed=M * K * 4 + K * N * 2 + M * N * out_itemsize)

    return pl.pallas_call(
        _matmul_kernel,
        out_shape=jax.ShapeDtypeStruct((M, N), out_dtype),
        grid_spec=pltpu.PrefetchScalarGridSpec(
            num_scalar_prefetch=0,
            grid=(grid_m,),
            in_specs=[
                pl.BlockSpec((tm, K), lambda i: (i, 0)),   # activation tiles
                pl.BlockSpec((K, N), lambda i: (0, 0)),    # resident weight
            ],
            out_specs=pl.BlockSpec((tm, N), lambda i: (i, 0)),
        ),
        compiler_params=pltpu.CompilerParams(
            dimension_semantics=("parallel",)),
        cost_estimate=cost,
    )(x, wb)


def xla_matmul(a, b, *, out_dtype=jnp.float32):
    """Pure-JAX f32 reference matmul with the same signature."""
    return jnp.dot(a, b, precision="highest",
                   preferred_element_type=jnp.float32).astype(out_dtype)


# ------------------------------ module glue ---------------------------------

def upsample(x, weights, *, matmul, out_dtype):
    """Upsample.forward: x @ weights.flatten(1) -> view(-1, channels)."""
    C = weights.shape[0]
    out = matmul(x, weights.reshape(C, C * 8), out_dtype=out_dtype)
    return out.reshape(-1, C)


def graph_conv(x, edge_index, edge_type, node_type, weights, *,
               n_edge_type, n_node_type, matmul, edges_sorted=False):
    """GraphConv.forward (use_bias=False, as constructed by GraphUpsample)."""
    if node_type is not None and n_node_type > 1:
        one_hot = jax.nn.one_hot(node_type, n_node_type, dtype=x.dtype)
        x = jnp.concatenate([x, one_hot], axis=1)
    row, col = edge_index[0], edge_index[1]
    index = row * n_edge_type + edge_type
    n_bucket = x.shape[0] * n_edge_type

    # TODO(synk): replace this gather + segment_sum with a scalar-prefetch
    # DMA-gather Pallas kernel over the (pre-sorted) edge buckets.
    gathered = jnp.take(x, col, axis=0).astype(jnp.float32)   # f32 accumulation
    sums = jax.ops.segment_sum(gathered, index, num_segments=n_bucket,
                               indices_are_sorted=edges_sorted)
    cnt = jax.ops.segment_sum(jnp.ones(index.shape, jnp.float32), index,
                              num_segments=n_bucket,
                              indices_are_sorted=edges_sorted)[:, None]
    col_data = jnp.where(cnt > 0, sums / jnp.maximum(cnt, 1.0), 0.0)
    col_data = col_data.reshape(x.shape[0], -1)      # [N, n_edge_type * C']
    return matmul(col_data, weights, out_dtype=jnp.float32)   # use_bias=False


def graph_upsample_forward(x, up_weights, conv_weights, node_child,
                           edge_index, edge_type, node_type, *,
                           n_edge_type, n_node_type, matmul=pallas_matmul,
                           feature_dtype=jnp.bfloat16, edges_sorted=False):
    """GraphUpsample.forward(x, doctree, d) with the doctree fields passed in.

    node_child: depth-d child indices (host metadata), < 0 means leaf.
    edge_index / edge_type / node_type: doctree.graph[d+1] fields, optionally
    pre-sorted by destination bucket (edges_sorted=True).
    """
    node_child = np.asarray(node_child)              # host-side, as in PyTorch
    numd = int(node_child.shape[0])
    n_prev = x.shape[0] - numd                       # coarser-level rows
    leaf_idx = np.nonzero(node_child < 0)[0]
    split_idx = np.nonzero(node_child >= 0)[0]

    # Head of depth-(d+1) features = [coarser nodes ; depth-d leaves]:
    # a single fused gather from x instead of slice + gather + concat.
    head_idx = np.concatenate([np.arange(n_prev), n_prev + leaf_idx])
    head = jnp.take(x, jnp.asarray(head_idx, dtype=jnp.int32),
                    axis=0).astype(feature_dtype)

    # Non-leaf depth-d nodes expand into 8 children on the MXU; bf16 output
    # halves the writeback and the downstream edge-gather traffic.
    out1_in = jnp.take(x, jnp.asarray(n_prev + split_idx, dtype=jnp.int32),
                       axis=0)
    out1 = upsample(out1_in, up_weights, matmul=matmul, out_dtype=feature_dtype)

    # TODO(synk): fuse this concat with the edge gather by remapping `col`
    # into the two source buffers instead of materializing `out`.
    out = jnp.concatenate([head, out1], axis=0)

    return graph_conv(out, edge_index, edge_type, node_type, conv_weights,
                      n_edge_type=n_edge_type, n_node_type=n_node_type,
                      matmul=matmul, edges_sorted=edges_sorted)


# --------------------------------- test --------------------------------------

if __name__ == "__main__":
    key = jax.random.PRNGKey(0)
    ks = jax.random.split(key, 6)

    # Small shapes consistent with the module.
    C_in, C_out = 8, 8
    n_edge_type, avg_degree, n_node_type = 7, 7, 0

    n_coarse, numd = 8, 8                      # x = coarser nodes + depth-d nodes
    x = jax.random.normal(ks[0], (n_coarse + numd, C_in), dtype=jnp.float32)

    # doctree-style metadata: child index per depth-d node, < 0 => leaf
    node_child = np.array([-1, 0, 1, -1, 2, 3, -1, 4], dtype=np.int32)
    n_leaf = int((node_child < 0).sum())
    n_split = numd - n_leaf
    n_next = n_coarse + n_leaf + 8 * n_split   # node count at depth d+1

    # Edges of the depth-(d+1) graph, pre-sorted by (row, edge_type) bucket on
    # the host (done once per doctree) so segment_sum sees sorted segments.
    E = n_next * avg_degree
    row_np = np.asarray(jax.random.randint(ks[1], (E,), 0, n_next))
    col_np = np.asarray(jax.random.randint(ks[2], (E,), 0, n_next))
    et_np = np.asarray(jax.random.randint(ks[3], (E,), 0, n_edge_type))
    order = np.argsort(row_np * n_edge_type + et_np, kind="stable")
    edge_index = jnp.asarray(np.stack([row_np[order], col_np[order]], axis=0),
                             dtype=jnp.int32)
    edge_type = jnp.asarray(et_np[order], dtype=jnp.int32)
    node_type = None                           # n_node_type == 0 -> no one-hot

    # parameters: Upsample.weights [C, C, 8]; GraphConv.weights (use_bias=False)
    node_channel = n_node_type if n_node_type > 1 else 0
    up_w = (jax.random.uniform(ks[4], (C_in, C_in, 8), dtype=jnp.float32) - 0.5) * 0.6
    conv_w = (jax.random.uniform(
        ks[5], (n_edge_type * (C_in + node_channel), C_out),
        dtype=jnp.float32) - 0.5) * 0.4

    out = jax.block_until_ready(graph_upsample_forward(
        x, up_w, conv_w, node_child, edge_index, edge_type, node_type,
        n_edge_type=n_edge_type, n_node_type=n_node_type,
        matmul=pallas_matmul, feature_dtype=jnp.bfloat16, edges_sorted=True))
    assert out.shape == (n_next, C_out)

    # Pure-JAX float32 reference (same glue, XLA dot at highest precision).
    ref = graph_upsample_forward(
        x, up_w, conv_w, node_child, edge_index, edge_type, node_type,
        n_edge_type=n_edge_type, n_node_type=n_node_type,
        matmul=xla_matmul, feature_dtype=jnp.float32, edges_sorted=True)

    # bf16 features / bf16 MXU operands with f32 accumulation -> loose tolerance.
    np.testing.assert_allclose(np.asarray(out), np.asarray(ref),
                               atol=5e-2, rtol=5e-2)
    print("KERNEL_OK")
</pallas_src>

<mosaic_0001>
module attributes {stable_mosaic.version = 11 : i64} {
  func.func @_matmul_kernel(%arg0: i32, %arg1: memref<8x8xf32, #tpu.memory_space<vmem>>, %arg2: memref<8x64xbf16, #tpu.memory_space<vmem>>, %arg3: memref<8x64xbf16, #tpu.memory_space<vmem>>) attributes {dimension_semantics = [#tpu.dimension_semantics<parallel>], iteration_bounds = array<i64: 1>, scalar_prefetch = 0 : i64, scratch_operands = 0 : i64, tpu.core_type = #tpu.core_type<tc>, window_params = [{transform_indices = @transform_0, window_bounds = array<i64: 8, 8>}, {pipeline_mode = #tpu.pipeline_mode<synchronous>, transform_indices = @transform_1, window_bounds = array<i64: 8, 64>}, {transform_indices = @transform_2, window_bounds = array<i64: 8, 64>}]} {
    %c0 = arith.constant 0 : index
    %c0_0 = arith.constant 0 : index
    %0 = vector.load %arg1[%c0, %c0_0] : memref<8x8xf32, #tpu.memory_space<vmem>>, vector<8x8xf32>
    %1 = arith.truncf %0 : vector<8x8xf32> to vector<8x8xbf16>
    %c0_1 = arith.constant 0 : index
    %c0_2 = arith.constant 0 : index
    %2 = vector.load %arg2[%c0_1, %c0_2] : memref<8x64xbf16, #tpu.memory_space<vmem>>, vector<8x64xbf16>
    %cst = arith.constant dense<0.000000e+00> : vector<8x64xf32>
    %3 = tpu.matmul %1, %2, %cst {dimension_numbers = #tpu.dot_dimension_numbers<[1], [0], [0], [1], [0, 0, 1, 1], [], []>} : vector<8x8xbf16>, vector<8x64xbf16>, vector<8x64xf32> -> vector<8x64xf32>
    %4 = arith.truncf %3 : vector<8x64xf32> to vector<8x64xbf16>
    %c0_3 = arith.constant 0 : index
    %c0_4 = arith.constant 0 : index
    %5 = vector.load %arg3[%c0_3, %c0_4] : memref<8x64xbf16, #tpu.memory_space<vmem>>, vector<8x64xbf16>
    tpu.vector_store %arg3[%c0_3, %c0_4], %4 {strides = array<i32>} : memref<8x64xbf16, #tpu.memory_space<vmem>>, vector<8x64xbf16>,
    return
  }
  func.func @transform_0(%arg0: i32) -> (i32, i32) {
    %c0_i32 = arith.constant 0 : i32
    %c0_i32_0 = arith.constant 0 : i32
    return %arg0, %c0_i32 : i32, i32
  }
  func.func @transform_1(%arg0: i32) -> (i32, i32) {
    %c0_i32 = arith.constant 0 : i32
    %c0_i32_0 = arith.constant 0 : i32
    %c0_i32_1 = arith.constant 0 : i32
    return %c0_i32, %c0_i32_0 : i32, i32
  }
  func.func @transform_2(%arg0: i32) -> (i32, i32) {
    %c0_i32 = arith.constant 0 : i32
    %c0_i32_0 = arith.constant 0 : i32
    return %arg0, %c0_i32 : i32, i32
  }
}

</mosaic_0001>

<bundles_post_ra>
// kernel: tpu_custom_call.1
= control target key start
LH: loop header
LB: loop body
LE: loop exit
PB: predicated region body
PF: predicated region fallthrough
CT: control target
= control target key end

     0   :  { %7 = vsyncpa [#allocation3], 0  ;;  %s195_s0 = inlined_call_operand.hbm [shape: f32[5,8], index: 0, kind: input, shape index: {}]   ;;  %s196_s1 = inlined_call_operand.hbm [shape: bf16[8,64], index: 1, kind: input, shape index: {}]   ;;  %s197_s2 = inlined_call_operand.hbm [shape: bf16[5,64], index: 2, kind: output, shape index: {}]  }
   0x1   :  { %8 = vsyncpa [#allocation6], 0 }
   0x2   :  { %9 = vsyncpa [#allocation4], 0  ;;  %s15_s11 = sshll.u32 %s195_s0, 4  ;;  %s168_s12 = smov [#allocation2]   ;;  %s16_s11 = int_to_ptr.hbm [resolvable:$true] %s15_s11 }
   0x3   :  { %s17_s13 = sshll.u32 %s168_s12, 4  ;;  %s26_s16 = sshll.u32 %s196_s1, 4  ;;  %s18_s13 = int_to_ptr.vmem [resolvable:$true] %s17_s13  ;;  %s27_s16 = int_to_ptr.hbm [resolvable:$true] %s26_s16 }
   0x4   :  { %20 = dma.hbm_to_vmem [thread:$0]  %s16_s11, 128, %s18_s13, [#allocation3]  }
   0x5   :  { %s169_s17 = smov [#allocation5]  }
   0x6   :  { %s28_s18 = sshll.u32 %s169_s17, 4  ;;  %s29_s18 = int_to_ptr.vmem [resolvable:$true] %s28_s18 }
   0x7   :  { %31 = dma.hbm_to_vmem [thread:$0]  %s27_s16, 64, %s29_s18, [#allocation6]  }
   0x8   :  { %162 = dma.done.wait [#allocation3], 128  }
   0x9   :  { %163 = vsyncadd [#allocation3], 4294967168 }
   0xa   :  { %164 = dma.done.wait [#allocation6], 64  }
   0xb   :  { %165 = vsyncadd [#allocation6], 4294967232  ;;  %vm48_vm0 = vcmask 1043456   ;;  %v43_v0 = vld [vmem:[#allocation5] sm:$0xf]  ;;  %v41_v1 = vld [vmem:[#allocation2] sm:$0xff] }
   0xc   :  { %v50_v2 = vsel %vm48_vm0, %v43_v0, 0  ;;  %v42_v3 = vpack.c.bf16 %v41_v1, %v41_v1  ;;  %vm44_vm1 = vcmask 64512   ;;  %s170_s0 = smov [#allocation7]   ;;  %s75_s21 = sshll.u32 %s197_s2, 4  ;;  %vm66_vm2 = vcmask 519168   ;;  %s76_s21 = int_to_ptr.hbm [resolvable:$true] %s75_s21 }
   0xd   :  { %59 = vmatpush.bf16.msra.mxu0 %v50_v2  ;;  %s73_s1 = sshll.u32 %s170_s0, 4  ;;  %s74_s1 = int_to_ptr.vmem [resolvable:$true] %s73_s1 }
  0x10   :  { %86 = vmatmul.msk.bf16.vlgmr.msra.gmra.mxu0 %vm44_vm1, %v42_v3 }
  0x8d   :  { %v61_v4 = vpop.f32.mrf.mxu0 }
  0x8e   :  { %v65_v5 = vpack.c.bf16 %v61_v4, %v61_v4 }
  0x90   :  { %67 = vst.msk [vmem:[#allocation7] sm:$0xf] %vm66_vm2, %v65_v5 }
  0x91   :  { %78 = dma.vmem_to_hbm [thread:$0]  %s74_s1, 64, %s76_s21, [#allocation4]  }
  0x95   :  { %v63_v6 = vpop.f32.mrf.mxu0 }
  0x96   :  { %166 = dma.done.wait [#allocation4], 64  }
  0x97   :  { %167 = vsyncadd [#allocation4], 4294967232 }
  0x98   :  { %83 = vsyncpa [#allocation3], 1 }
  0x99   :  { %84 = vsyncpa [#allocation6], 1 }
  0x9a   :  { %85 = vsyncpa [#allocation4], 1 }

</bundles_post_ra>
